<compile_context>
chip_gen: v7x
topology: tpu7x:2x2x1
jax: 0.10.0
libtpu: 0.0.40
codegen_flags: <defaults>
</compile_context>

<pallas_src>
import functools

import jax
import jax.numpy as jnp
import numpy as np
from jax.experimental import pallas as pl
from jax.experimental.pallas import tpu as pltpu

BN_EPS = 1e-5


def _round_up(x, m):
    return (x + m - 1) // m * m


# ----------------------------- Pallas kernel --------------------------------
def _generator_kernel(n, x_ref, w1_ref, perchan_ref, w2_ref, o_ref, feat_ref):
    """Fused: polynomial features -> Linear1 -> BatchNorm(train) -> ReLU -> Linear2.

    x_ref:       (B, n)          raw noise
    w1_ref:      (k_pad, h_pad)  packed Linear1 weight:
                                   rows [0, n)        = deg1 weights
                                   rows [n, n+n*n)    = asymmetric deg2 weights
                                     (row n+i*n+j = W1[n + triu(i,j)] if i<=j else 0)
                                   remaining rows zero.  (b1 omitted: cancels under BN.)
    perchan_ref: (3, h_pad)      row0 = gamma, row1 = beta, row2[:4] = b2 (zero-padded)
    w2_ref:      (h_pad, 4)      second Linear weight (zero rows past true hidden width)
    o_ref:       (B, 4)
    feat_ref:    (B, k_pad)      VMEM scratch holding [x | x_i*x over i | 0]
    """
    x = x_ref[...]                                             # (B, n) f32

    # --- build polynomial-feature slab on-chip: feat = [deg1 | scaled outer | 0] ---
    feat_ref[...] = jnp.zeros_like(feat_ref)                   # clear pad lanes once
    feat_ref[:, :n] = x
    for i in range(n):                                         # n tiny VPU broadcasts
        feat_ref[:, n + i * n:n + (i + 1) * n] = x[:, i:i + 1] * x

    # --- Linear 1: single K=128 MXU matmul (deg1 + deg2 contributions together) ---
    h = jnp.dot(feat_ref[...], w1_ref[...], preferred_element_type=jnp.float32)

    # --- BatchNorm1d, training mode (biased batch variance); center once ---
    mean = jnp.mean(h, axis=0, keepdims=True)
    hc = h - mean
    var = jnp.mean(hc * hc, axis=0, keepdims=True)
    gamma = perchan_ref[0:1, :]
    beta = perchan_ref[1:2, :]
    h = hc * jax.lax.rsqrt(var + BN_EPS) * gamma + beta

    # --- ReLU ---
    h = jnp.maximum(h, 0.0)

    # --- Linear 2: (B, 4) output, stored directly (single-vreg masked store) ---
    b2 = perchan_ref[2:3, 0:4]
    o_ref[...] = jnp.dot(h, w2_ref[...], preferred_element_type=jnp.float32) + b2


def generator_block_pallas(noise, w1p, perchan, w2p):
    B, n = noise.shape
    k_pad, _ = w1p.shape
    kernel = functools.partial(_generator_kernel, n)
    return pl.pallas_call(
        kernel,
        out_shape=jax.ShapeDtypeStruct((B, 4), jnp.float32),
        # No grid: everything (<1 MiB) is staged into VMEM in one shot.
        in_specs=[pl.BlockSpec(memory_space=pltpu.MemorySpace.VMEM)] * 4,
        out_specs=pl.BlockSpec(memory_space=pltpu.MemorySpace.VMEM),
        scratch_shapes=[pltpu.VMEM((B, k_pad), jnp.float32)],
    )(noise, w1p, perchan, w2p)


# ------------------------------ Params ---------------------------------------
def init_params(key, noise_dim):
    """Raw parameters matching PyTorch module defaults."""
    n = noise_dim
    latent_dim = n + n * (n + 1) // 2
    hidden = 4 * latent_dim
    k1, k2, k3, k4 = jax.random.split(key, 4)

    # nn.Linear default init: U(-1/sqrt(fan_in), 1/sqrt(fan_in)); weights stored as (in, out)
    lim1 = 1.0 / np.sqrt(latent_dim)
    w1 = jax.random.uniform(k1, (latent_dim, hidden), jnp.float32, -lim1, lim1)
    b1 = jax.random.uniform(k2, (1, hidden), jnp.float32, -lim1, lim1)

    # nn.BatchNorm1d default affine: weight=1, bias=0
    gamma = jnp.ones((1, hidden), jnp.float32)
    beta = jnp.zeros((1, hidden), jnp.float32)

    lim2 = 1.0 / np.sqrt(hidden)
    w2 = jax.random.uniform(k3, (hidden, 4), jnp.float32, -lim2, lim2)
    b2 = jax.random.uniform(k4, (1, 4), jnp.float32, -lim2, lim2)
    return w1, b1, gamma, beta, w2, b2


def expand_params(raw, noise_dim):
    """One-time host-side repack: fold triu gather into W1, pad for lane density.

    - b1 is dropped: any per-channel constant added by Linear1 cancels exactly in
      the train-mode BatchNorm mean subtraction (and does not affect variance).
    - Zero padding of gamma/beta/w2 keeps padded hidden columns exactly 0 through
      BN (var=0 -> rsqrt(eps) * gamma=0) / ReLU / Linear2.
    """
    w1, b1, gamma, beta, w2, b2 = (np.asarray(p, np.float32) for p in raw)
    del b1  # cancels under train-mode BatchNorm
    n = noise_dim
    L = n + n * (n + 1) // 2
    H = 4 * L
    assert w1.shape == (L, H)
    k_pad = _round_up(n + n * n, 128)
    h_pad = _round_up(H, 128)

    # Packed Linear1 weight: deg1 rows, then asymmetric deg2 rows (i-major), then zeros.
    # W_asym[i, j] = W1[n + triu(i, j)] for i<=j (row-major triu, matching
    # torch.masked_select order), 0 otherwise, so
    #   sum_{i,j} x_i x_j W_asym[i,j] == sum_{i<=j} x_i x_j W1[n + triu(i,j)].
    w1p = np.zeros((k_pad, h_pad), np.float32)
    w1p[:n, :H] = w1[:n]
    iu, ju = np.triu_indices(n)
    w_asym = np.zeros((n, n, H), np.float32)
    w_asym[iu, ju] = w1[n:]
    w1p[n:n + n * n, :H] = w_asym.reshape(n * n, H)

    # Per-channel vectors packed into one operand: gamma / beta / b2.
    perchan = np.zeros((3, h_pad), np.float32)
    perchan[0, :H] = gamma.reshape(-1)
    perchan[1, :H] = beta.reshape(-1)
    perchan[2, :4] = b2.reshape(-1)

    w2p = np.zeros((h_pad, 4), np.float32)
    w2p[:H, :] = w2
    return tuple(jnp.asarray(p) for p in (w1p, perchan, w2p))


# ------------------------------ Forward ---------------------------------------
@jax.jit
def generator_forward(noise, w1p, perchan, w2p):
    B = noise.shape[0]
    out = generator_block_pallas(noise, w1p, perchan, w2p)
    return out.reshape(B, 2, 2)


def generator_forward_ref(noise, w1, b1, gamma, beta, w2, b2):
    """Pure-JAX reference following the PyTorch module exactly (unfused, unpadded)."""
    B, n = noise.shape
    outer = noise[:, :, None] * noise[:, None, :]                 # (B, n, n)
    iu, ju = np.triu_indices(n)                                   # row-major i<=j order
    deg2 = outer[:, iu, ju]                                       # (B, n(n+1)/2)
    feat = jnp.concatenate([noise, deg2], axis=1)                 # (B, L)
    h = feat @ w1 + b1
    mean = jnp.mean(h, axis=0, keepdims=True)
    var = jnp.mean((h - mean) ** 2, axis=0, keepdims=True)
    h = (h - mean) / jnp.sqrt(var + BN_EPS) * gamma + beta
    h = jnp.maximum(h, 0.0)
    out = h @ w2 + b2
    return out.reshape(B, 2, 2)


if __name__ == "__main__":
    noise_dim = 8
    batch = 8

    key = jax.random.PRNGKey(0)
    k_noise, k_params = jax.random.split(key)
    noise = jax.random.normal(k_noise, (batch, noise_dim), jnp.float32)

    raw_params = init_params(k_params, noise_dim)
    packed_params = expand_params(raw_params, noise_dim)

    out = generator_forward(noise, *packed_params)
    out = jax.block_until_ready(out)

    ref = generator_forward_ref(noise, *raw_params)
    assert out.shape == (batch, 2, 2), out.shape
    np.testing.assert_allclose(np.asarray(out), np.asarray(ref), rtol=5e-4, atol=5e-4)

    print("KERNEL_OK")
</pallas_src>

<mosaic_0001>
module attributes {stable_mosaic.version = 11 : i64} {
  func.func @_generator_kernel(%arg0: memref<8x8xf32, #tpu.memory_space<vmem>>, %arg1: memref<128x256xf32, #tpu.memory_space<vmem>>, %arg2: memref<3x256xf32, #tpu.memory_space<vmem>>, %arg3: memref<256x4xf32, #tpu.memory_space<vmem>>, %arg4: memref<8x4xf32, #tpu.memory_space<vmem>>, %arg5: memref<8x128xf32, #tpu.memory_space<vmem>>) attributes {dimension_semantics = [], scalar_prefetch = 0 : i64, scratch_operands = 1 : i64, tpu.core_type = #tpu.core_type<tc>} {
    %c0 = arith.constant 0 : index
    %c0_0 = arith.constant 0 : index
    %0 = vector.load %arg0[%c0, %c0_0] : memref<8x8xf32, #tpu.memory_space<vmem>>, vector<8x8xf32>
    %cst = arith.constant 0.000000e+00 : f32
    %1 = vector.broadcast %cst : f32 to vector<8x128xf32>
    %c0_1 = arith.constant 0 : index
    %c0_2 = arith.constant 0 : index
    %2 = vector.load %arg5[%c0_1, %c0_2] : memref<8x128xf32, #tpu.memory_space<vmem>>, vector<8x128xf32>
    tpu.vector_store %arg5[%c0_1, %c0_2], %1 {strides = array<i32>} : memref<8x128xf32, #tpu.memory_space<vmem>>, vector<8x128xf32>,
    %c0_3 = arith.constant 0 : index
    %c0_4 = arith.constant 0 : index
    %3 = vector.load %arg5[%c0_3, %c0_4] : memref<8x128xf32, #tpu.memory_space<vmem>>, vector<8x8xf32>
    tpu.vector_store %arg5[%c0_3, %c0_4], %0 {strides = array<i32>} : memref<8x128xf32, #tpu.memory_space<vmem>>, vector<8x8xf32>,
    %4 = vector.extract_strided_slice %0 {offsets = [0, 0], sizes = [8, 1], strides = [1, 1]} : vector<8x8xf32> to vector<8x1xf32>
    %5 = vector.broadcast %4 : vector<8x1xf32> to vector<8x8xf32>
    %6 = arith.mulf %5, %0 : vector<8x8xf32>
    %c0_5 = arith.constant 0 : index
    %c8 = arith.constant 8 : index
    %7 = vector.load %arg5[%c0_5, %c8] : memref<8x128xf32, #tpu.memory_space<vmem>>, vector<8x8xf32>
    tpu.vector_store %arg5[%c0_5, %c8], %6 {strides = array<i32>} : memref<8x128xf32, #tpu.memory_space<vmem>>, vector<8x8xf32>,
    %8 = vector.extract_strided_slice %0 {offsets = [0, 1], sizes = [8, 1], strides = [1, 1]} : vector<8x8xf32> to vector<8x1xf32>
    %9 = vector.broadcast %8 : vector<8x1xf32> to vector<8x8xf32>
    %10 = arith.mulf %9, %0 : vector<8x8xf32>
    %c0_6 = arith.constant 0 : index
    %c16 = arith.constant 16 : index
    %11 = vector.load %arg5[%c0_6, %c16] : memref<8x128xf32, #tpu.memory_space<vmem>>, vector<8x8xf32>
    tpu.vector_store %arg5[%c0_6, %c16], %10 {strides = array<i32>} : memref<8x128xf32, #tpu.memory_space<vmem>>, vector<8x8xf32>,
    %12 = vector.extract_strided_slice %0 {offsets = [0, 2], sizes = [8, 1], strides = [1, 1]} : vector<8x8xf32> to vector<8x1xf32>
    %13 = vector.broadcast %12 : vector<8x1xf32> to vector<8x8xf32>
    %14 = arith.mulf %13, %0 : vector<8x8xf32>
    %c0_7 = arith.constant 0 : index
    %c24 = arith.constant 24 : index
    %15 = vector.load %arg5[%c0_7, %c24] : memref<8x128xf32, #tpu.memory_space<vmem>>, vector<8x8xf32>
    tpu.vector_store %arg5[%c0_7, %c24], %14 {strides = array<i32>} : memref<8x128xf32, #tpu.memory_space<vmem>>, vector<8x8xf32>,
    %16 = vector.extract_strided_slice %0 {offsets = [0, 3], sizes = [8, 1], strides = [1, 1]} : vector<8x8xf32> to vector<8x1xf32>
    %17 = vector.broadcast %16 : vector<8x1xf32> to vector<8x8xf32>
    %18 = arith.mulf %17, %0 : vector<8x8xf32>
    %c0_8 = arith.constant 0 : index
    %c32 = arith.constant 32 : index
    %19 = vector.load %arg5[%c0_8, %c32] : memref<8x128xf32, #tpu.memory_space<vmem>>, vector<8x8xf32>
    tpu.vector_store %arg5[%c0_8, %c32], %18 {strides = array<i32>} : memref<8x128xf32, #tpu.memory_space<vmem>>, vector<8x8xf32>,
    %20 = vector.extract_strided_slice %0 {offsets = [0, 4], sizes = [8, 1], strides = [1, 1]} : vector<8x8xf32> to vector<8x1xf32>
    %21 = vector.broadcast %20 : vector<8x1xf32> to vector<8x8xf32>
    %22 = arith.mulf %21, %0 : vector<8x8xf32>
    %c0_9 = arith.constant 0 : index
    %c40 = arith.constant 40 : index
    %23 = vector.load %arg5[%c0_9, %c40] : memref<8x128xf32, #tpu.memory_space<vmem>>, vector<8x8xf32>
    tpu.vector_store %arg5[%c0_9, %c40], %22 {strides = array<i32>} : memref<8x128xf32, #tpu.memory_space<vmem>>, vector<8x8xf32>,
    %24 = vector.extract_strided_slice %0 {offsets = [0, 5], sizes = [8, 1], strides = [1, 1]} : vector<8x8xf32> to vector<8x1xf32>
    %25 = vector.broadcast %24 : vector<8x1xf32> to vector<8x8xf32>
    %26 = arith.mulf %25, %0 : vector<8x8xf32>
    %c0_10 = arith.constant 0 : index
    %c48 = arith.constant 48 : index
    %27 = vector.load %arg5[%c0_10, %c48] : memref<8x128xf32, #tpu.memory_space<vmem>>, vector<8x8xf32>
    tpu.vector_store %arg5[%c0_10, %c48], %26 {strides = array<i32>} : memref<8x128xf32, #tpu.memory_space<vmem>>, vector<8x8xf32>,
    %28 = vector.extract_strided_slice %0 {offsets = [0, 6], sizes = [8, 1], strides = [1, 1]} : vector<8x8xf32> to vector<8x1xf32>
    %29 = vector.broadcast %28 : vector<8x1xf32> to vector<8x8xf32>
    %30 = arith.mulf %29, %0 : vector<8x8xf32>
    %c0_11 = arith.constant 0 : index
    %c56 = arith.constant 56 : index
    %31 = vector.load %arg5[%c0_11, %c56] : memref<8x128xf32, #tpu.memory_space<vmem>>, vector<8x8xf32>
    tpu.vector_store %arg5[%c0_11, %c56], %30 {strides = array<i32>} : memref<8x128xf32, #tpu.memory_space<vmem>>, vector<8x8xf32>,
    %32 = vector.extract_strided_slice %0 {offsets = [0, 7], sizes = [8, 1], strides = [1, 1]} : vector<8x8xf32> to vector<8x1xf32>
    %33 = vector.broadcast %32 : vector<8x1xf32> to vector<8x8xf32>
    %34 = arith.mulf %33, %0 : vector<8x8xf32>
    %c0_12 = arith.constant 0 : index
    %c64 = arith.constant 64 : index
    %35 = vector.load %arg5[%c0_12, %c64] : memref<8x128xf32, #tpu.memory_space<vmem>>, vector<8x8xf32>
    tpu.vector_store %arg5[%c0_12, %c64], %34 {strides = array<i32>} : memref<8x128xf32, #tpu.memory_space<vmem>>, vector<8x8xf32>,
    %c0_13 = arith.constant 0 : index
    %c0_14 = arith.constant 0 : index
    %36 = vector.load %arg5[%c0_13, %c0_14] : memref<8x128xf32, #tpu.memory_space<vmem>>, vector<8x128xf32>
    %c0_15 = arith.constant 0 : index
    %c0_16 = arith.constant 0 : index
    %37 = vector.load %arg1[%c0_15, %c0_16] : memref<128x256xf32, #tpu.memory_space<vmem>>, vector<128x256xf32>
    %cst_17 = arith.constant dense<0.000000e+00> : vector<8x256xf32>
    %38 = tpu.matmul %36, %37, %cst_17 {dimension_numbers = #tpu.dot_dimension_numbers<[1], [0], [0], [1], [0, 0, 1, 1], [], []>} : vector<8x128xf32>, vector<128x256xf32>, vector<8x256xf32> -> vector<8x256xf32>
    %cst_18 = arith.constant dense<0.000000e+00> : vector<256xf32>
    %39 = vector.multi_reduction <add>, %38, %cst_18 [0] : vector<8x256xf32> to vector<256xf32>
    %40 = vector.shape_cast %39 : vector<256xf32> to vector<1x256xf32>
    %cst_19 = arith.constant 8.000000e+00 : f32
    %41 = vector.broadcast %cst_19 : f32 to vector<1x256xf32>
    %42 = arith.divf %40, %41 : vector<1x256xf32>
    %43 = vector.broadcast %42 : vector<1x256xf32> to vector<8x256xf32>
    %44 = arith.subf %38, %43 : vector<8x256xf32>
    %45 = arith.mulf %44, %44 : vector<8x256xf32>
    %cst_20 = arith.constant dense<0.000000e+00> : vector<256xf32>
    %46 = vector.multi_reduction <add>, %45, %cst_20 [0] : vector<8x256xf32> to vector<256xf32>
    %47 = vector.shape_cast %46 : vector<256xf32> to vector<1x256xf32>
    %cst_21 = arith.constant 8.000000e+00 : f32
    %48 = vector.broadcast %cst_21 : f32 to vector<1x256xf32>
    %49 = arith.divf %47, %48 : vector<1x256xf32>
    %c0_22 = arith.constant 0 : index
    %c0_23 = arith.constant 0 : index
    %50 = vector.load %arg2[%c0_22, %c0_23] : memref<3x256xf32, #tpu.memory_space<vmem>>, vector<1x256xf32>
    %c1 = arith.constant 1 : index
    %c0_24 = arith.constant 0 : index
    %51 = vector.load %arg2[%c1, %c0_24] : memref<3x256xf32, #tpu.memory_space<vmem>>, vector<1x256xf32>
    %cst_25 = arith.constant 9.99999974E-6 : f32
    %52 = vector.broadcast %cst_25 : f32 to vector<1x256xf32>
    %53 = arith.addf %49, %52 : vector<1x256xf32>
    %54 = math.rsqrt %53 : vector<1x256xf32>
    %55 = vector.broadcast %54 : vector<1x256xf32> to vector<8x256xf32>
    %56 = arith.mulf %44, %55 : vector<8x256xf32>
    %57 = vector.broadcast %50 : vector<1x256xf32> to vector<8x256xf32>
    %58 = arith.mulf %56, %57 : vector<8x256xf32>
    %59 = vector.broadcast %51 : vector<1x256xf32> to vector<8x256xf32>
    %60 = arith.addf %58, %59 : vector<8x256xf32>
    %cst_26 = arith.constant 0.000000e+00 : f32
    %61 = vector.broadcast %cst_26 : f32 to vector<8x256xf32>
    %62 = arith.maximumf %60, %61 : vector<8x256xf32>
    %c2 = arith.constant 2 : index
    %c0_27 = arith.constant 0 : index
    %63 = vector.load %arg2[%c2, %c0_27] : memref<3x256xf32, #tpu.memory_space<vmem>>, vector<1x4xf32>
    %c0_28 = arith.constant 0 : index
    %c0_29 = arith.constant 0 : index
    %64 = vector.load %arg3[%c0_28, %c0_29] : memref<256x4xf32, #tpu.memory_space<vmem>>, vector<256x4xf32>
    %cst_30 = arith.constant dense<0.000000e+00> : vector<8x4xf32>
    %65 = tpu.matmul %62, %64, %cst_30 {dimension_numbers = #tpu.dot_dimension_numbers<[1], [0], [0], [1], [0, 0, 1, 1], [], []>} : vector<8x256xf32>, vector<256x4xf32>, vector<8x4xf32> -> vector<8x4xf32>
    %66 = vector.broadcast %63 : vector<1x4xf32> to vector<8x4xf32>
    %67 = arith.addf %65, %66 : vector<8x4xf32>
    %c0_31 = arith.constant 0 : index
    %c0_32 = arith.constant 0 : index
    %68 = vector.load %arg4[%c0_31, %c0_32] : memref<8x4xf32, #tpu.memory_space<vmem>>, vector<8x4xf32>
    tpu.vector_store %arg4[%c0_31, %c0_32], %67 {strides = array<i32>} : memref<8x4xf32, #tpu.memory_space<vmem>>, vector<8x4xf32>,
    return
  }
}

</mosaic_0001>

<bundles_post_ra>
// kernel: generator_forward.1
= control target key start
LH: loop header
LB: loop body
LE: loop exit
PB: predicated region body
PF: predicated region fallthrough
CT: control target
= control target key end

     0   :  { %9 = vsyncpa [#allocation4], 0  ;;  %s565_s15 = smov [#allocation3]   ;;  %s837_s0 = inlined_call_operand.vmem [shape: f32[8,8], index: 0, kind: input, shape index: {}]   ;;  %s838_s1 = inlined_call_operand.vmem [shape: f32[128,256], index: 1, kind: input, shape index: {}]   ;;  %s839_s2 = inlined_call_operand.hbm [shape: f32[3,256], index: 2, kind: input, shape index: {}]   ;;  %s840_s3 = inlined_call_operand.vmem [shape: f32[256,4], index: 3, kind: input, shape index: {}]   ;;  %s841_s4 = inlined_call_operand.vmem [shape: f32[8,4], index: 4, kind: output, shape index: {}]  }
   0x1   :  { %s20_s16 = sshll.u32 %s565_s15, 4  ;;  %s541_s19 = scalar_lea.hbm %s839_s2, 128  ;;  %s21_s16 = int_to_ptr.vmem [resolvable:$true] %s20_s16 }
   0x2   :  { %p542_p0 = scmp.ne.s32.totalorder %s839_s2, %s541_s19  ;;  %p545_p1 = scmp.lt.u32.totalorder %s541_s19, %s839_s2 }
   0x4   :  { %p547_p2 = pnand %p545_p1, %p542_p0 }
   0x6   :  { %550 = shalt.err (!%p547_p2)
}
   0x7   :  { %s551_s24 = scalar_lea.vmem %s21_s16, 128  ;;  %p556_p4 = scmp.lt.s32.totalorder %s21_s16, %s21_s16 }
   0x8   :  { %p552_p3 = scmp.ne.s32.totalorder %s21_s16, %s551_s24  ;;  %p557_p5 = scmp.lt.s32.totalorder %s551_s24, %s551_s24 }
   0xa   :  { %p558_p6 = por %p557_p5, %p556_p4 }
   0xc   :  { %p559_p7 = pnand %p558_p6, %p552_p3 }
   0xe   :  { %562 = shalt.err (!%p559_p7)
}
   0xf   :  { %23 = dma.hbm_to_vmem [thread:$0]  %s839_s2, 128, %s21_s16, [#allocation4]  }
  0x10   :  { %563 = dma.done.wait [#allocation4], 128  }
  0x11   :  { %564 = vsyncadd [#allocation4], 4294967168  ;;  %v566_v0 = vmov 2   ;;  %v567_v1 = vmov 0   ;;  %v623_v2 = vld [vmem:[%s837_s0] sm:$0xff]  ;;  %v568_v3 = vmov 3  }
  0x12   :  { %530 = vset.pattern.permute.xlu1 %v566_v0  ;;  %528 = vset.pattern.permute.xlu0 %v567_v1  ;;  %v569_v4 = vmov 1   ;;  %v570_v5 = vmov 4   ;;  %v571_v6 = vmov 5   ;;  %v572_v7 = vmov 6   ;;  %v124_v9 = vld [vmem:[%s838_s1 + $0x8] sm:$0xff]  ;;  %v126_v10 = vld [vmem:[%s838_s1 + $0x18] sm:$0xff] }
  0x13   :  { %57 = vperm.xlu1 %530, %v623_v2   ;;  %35 = vperm.xlu0 %528, %v623_v2   ;;  %v573_v8 = vmov 7   ;;  %v123_v11 = vld [vmem:[%s838_s1] sm:$0xff]  ;;  %v446_v12 = vpack.c.bf16 %v126_v10, %v124_v9  ;;  %v125_v13 = vld [vmem:[%s838_s1 + $0x10] sm:$0xff]  ;;  %v128_v15 = vld [vmem:[%s838_s1 + $0x28] sm:$0xff]  ;;  %v574_v23 = vmov 0.0   ;;  %vm31_vm0 = vcmask 64512  }
  0x14   :  { %v448_v14 = vpack.c.bf16 %v125_v13, %v123_v11  ;;  %v130_v16 = vld [vmem:[%s838_s1 + $0x38] sm:$0xff]  ;;  %v127_v18 = vld [vmem:[%s838_s1 + $0x20] sm:$0xff]  ;;  %v129_v19 = vld [vmem:[%s838_s1 + $0x30] sm:$0xff]  ;;  %30 = vst [vmem:[#allocation2] sm:$0xff] %v574_v23  ;;  %219 = vmatprep.mubr.f32.mxu0 %v574_v23  ;;  %s575_s13 = smov 8   ;;  %s576_s22 = smov 24  }
  0x15   :  { %447 = vmatprep.subr.bf16.mxu0 %v446_v12  ;;  %v450_v17 = vpack.c.bf16 %v130_v16, %v128_v15  ;;  %v452_v20 = vpack.c.bf16 %v129_v19, %v127_v18  ;;  %v132_v21 = vld [vmem:[%s838_s1 + $0x48] sm:$0xff]  ;;  %v134_v22 = vld [vmem:[%s838_s1 + $0x58] sm:$0xff]  ;;  %v131_v25 = vld [vmem:[%s838_s1 + $0x40] sm:$0xff]  ;;  %32 = vst.msk [vmem:[#allocation2] sm:$0xff] %vm31_vm0, %v623_v2  ;;  %s577_s27 = smov 16   ;;  %s578_s12 = smov 32  }
  0x16   :  { %449 = vmatpush1.bf16.msra.mxu0 %v448_v14  ;;  %v454_v24 = vpack.c.bf16 %v134_v22, %v132_v21  ;;  %v133_v26 = vld [vmem:[%s838_s1 + $0x50] sm:$0xff]  ;;  %v136_v28 = vld [vmem:[%s838_s1 + $0x68] sm:$0xff]  ;;  %v138_v29 = vld [vmem:[%s838_s1 + $0x78] sm:$0xff]  ;;  %s580_s14 = smov 48   ;;  %s581_s15 = smov 56   ;;  %vm43_vm1 = vcmask 130112  }
  0x17   :  { %531 = vset.pattern.permute.xlu1 %v568_v3  ;;  %529 = vset.pattern.permute.xlu0 %v569_v4  ;;  %v456_v27 = vpack.c.bf16 %v133_v26, %v131_v25  ;;  %v458_v30 = vpack.c.bf16 %v138_v29, %v136_v28  ;;  %v135_v31 = vld [vmem:[%s838_s1 + $0x60] sm:$0xff]  ;;  %v137_v32 = vld [vmem:[%s838_s1 + $0x70] sm:$0xff]  ;;  %v140_v34 = vld [vmem:[%s838_s1 + $0x88] sm:$0xff]  ;;  %vm54_vm2 = vcmask 195712   ;;  %vm65_vm3 = vcmask 261312  }
  0x18   :  { %68 = vperm.xlu1 %531, %v623_v2   ;;  %46 = vperm.xlu0 %529, %v623_v2   ;;  %v460_v33 = vpack.c.bf16 %v137_v32, %v135_v31  ;;  %v142_v35 = vld [vmem:[%s838_s1 + $0x98] sm:$0xff]  ;;  %v139_v36 = vld [vmem:[%s838_s1 + $0x80] sm:$0xff]  ;;  %v141_v40 = vld [vmem:[%s838_s1 + $0x90] sm:$0xff]  ;;  %vm76_vm4 = vcmask 326912   ;;  %vm87_vm5 = vcmask 392512   ;;  %vm98_vm6 = vcmask 458112  }
  0x19   :  { %451 = vmatprep.subr.bf16.mxu0 %v450_v17  ;;  %v462_v39 = vpack.c.bf16 %v142_v35, %v140_v34  ;;  %v464_v42 = vpack.c.bf16 %v141_v40, %v139_v36  ;;  %v144_v43 = vld [vmem:[%s838_s1 + $0xa8] sm:$0xff]  ;;  %v146_v44 = vld [vmem:[%s838_s1 + $0xb8] sm:$0xff]  ;;  %v143_v46 = vld [vmem:[%s838_s1 + $0xa0] sm:$0xff]  ;;  %vm109_vm7 = vcmask 523712   ;;  %vm120_vm8 = vcmask 589312  }
  0x1a   :  { %453 = vmatpush1.bf16.msra.mxu0 %v452_v20  ;;  %v466_v45 = vpack.c.bf16 %v146_v44, %v144_v43  ;;  %v145_v47 = vld [vmem:[%s838_s1 + $0xb0] sm:$0xff]  ;;  %v148_v53 = vld [vmem:[%s838_s1 + $0xc8] sm:$0xff]  ;;  %v150_v54 = vld [vmem:[%s838_s1 + $0xd8] sm:$0xff]  ;;  %vm403_vm9 = vcmask 31744  }
  0x1b   :  { %455 = vmatprep.subr.bf16.mxu0 %v454_v24  ;;  %v468_v51 = vpack.c.bf16 %v145_v47, %v143_v46  ;;  %v470_v55 = vpack.c.bf16 %v150_v54, %v148_v53  ;;  %v147_v56 = vld [vmem:[%s838_s1 + $0xc0] sm:$0xff]  ;;  %v149_v57 = vld [vmem:[%s838_s1 + $0xd0] sm:$0xff]  ;;  %v152_v59 = vld [vmem:[%s838_s1 + $0xe8] sm:$0xff] }
  0x1c   :  { %532 = vset.pattern.permute.xlu1 %v570_v5  ;;  %533 = vset.pattern.permute.xlu0 %v571_v6  ;;  %v472_v58 = vpack.c.bf16 %v149_v57, %v147_v56  ;;  %v154_v60 = vld [vmem:[%s838_s1 + $0xf8] sm:$0xff]  ;;  %v151_v61 = vld [vmem:[%s838_s1 + $0xe0] sm:$0xff]  ;;  %v153_v3 = vld [vmem:[%s838_s1 + $0xf0] sm:$0xff]  ;;  %s582_s1 = smov 64  }
  0x1d   :  { %79 = vperm.xlu1 %532, %v623_v2   ;;  %90 = vperm.xlu0 %533, %v623_v2   ;;  %v474_v1 = vpack.c.bf16 %v154_v60, %v152_v59  ;;  %v476_v5 = vpack.c.bf16 %v153_v3, %v151_v61  ;;  %v313_v19 = vld [vmem:[%s840_s3 + $0x80] sm:$0xff]  ;;  %v314_v20 = vld [vmem:[%s840_s3 + $0x88] sm:$0xff]  ;;  %v315_v25 = vld [vmem:[%s840_s3 + $0x90] sm:$0xff] }
  0x1e   :  { %457 = vmatpush1.bf16.msra.mxu0 %v456_v27  ;;  %v478_v21 = vpack.c.bf16 %v314_v20, %v313_v19  ;;  %v297_v22 = vld [vmem:[%s840_s3] sm:$0xff]  ;;  %v298_v23 = vld [vmem:[%s840_s3 + $0x8] sm:$0xff]  ;;  %v316_v26 = vld [vmem:[%s840_s3 + $0x98] sm:$0xff] }
  0x1f   :  { %459 = vmatprep.subr.bf16.mxu0 %v458_v30  ;;  %v480_v24 = vpack.c.bf16 %v298_v23, %v297_v22  ;;  %v482_v27 = vpack.c.bf16 %v316_v26, %v315_v25  ;;  %v299_v28 = vld [vmem:[%s840_s3 + $0x10] sm:$0xff]  ;;  %v300_v29 = vld [vmem:[%s840_s3 + $0x18] sm:$0xff]  ;;  %v317_v31 = vld [vmem:[%s840_s3 + $0xa0] sm:$0xff] }
  0x20   :  { %479 = vmatprep.subr.bf16.mxu1 %v478_v21  ;;  %v484_v30 = vpack.c.bf16 %v300_v29, %v299_v28  ;;  %v318_v32 = vld [vmem:[%s840_s3 + $0xa8] sm:$0xff]  ;;  %v301_v34 = vld [vmem:[%s840_s3 + $0x20] sm:$0xff]  ;;  %v303_v40 = vld [vmem:[%s840_s3 + $0x30] sm:$0xff] }
  0x21   :  { %534 = vset.pattern.permute.xlu1 %v572_v7  ;;  %536 = vset.pattern.permute.xlu0 %v573_v8  ;;  %v302_v35 = vld [vmem:[%s840_s3 + $0x28] sm:$0xff]  ;;  %v321_v43 = vld [vmem:[%s840_s3 + $0xc0] sm:$0xff]  ;;  %v308_v53 = vld [vmem:[%s840_s3 + $0x58] sm:$0xff] }
  0x22   :  { %101 = vperm.xlu1 %534, %v623_v2   ;;  %461 = vmatpush1.bf16.msra.mxu0 %v460_v33  ;;  %v486_v33 = vpack.c.bf16 %v318_v32, %v317_v31  ;;  %v488_v36 = vpack.c.bf16 %v302_v35, %v301_v34  ;;  %v322_v44 = vld [vmem:[%s840_s3 + $0xc8] sm:$0xff]  ;;  %v305_v46 = vld [vmem:[%s840_s3 + $0x40] sm:$0xff]  ;;  %v327_v61 = vld [vmem:[%s840_s3 + $0xf0] sm:$0xff] }
  0x23   :  { %463 = vmatprep.subr.bf16.mxu0 %v462_v39  ;;  %481 = vmatpush3.bf16.msra.mxu1 %v480_v24  ;;  %v306_v47 = vld [vmem:[%s840_s3 + $0x48] sm:$0xff] }
  0x24   :  { %483 = vmatprep.subr.bf16.mxu1 %v482_v27  ;;  %v326_v56 = vld [vmem:[%s840_s3 + $0xe8] sm:$0xff] }
  0x25   :  { %v310_v59 = vld [vmem:[%s840_s3 + $0x68] sm:$0xff] }
  0x26   :  { %535 = vset.pattern.permute.xlu1 %v573_v8  ;;  %465 = vmatpush1.bf16.msra.mxu0 %v464_v42 }
  0x27   :  { %112 = vperm.xlu1 %535, %v623_v2   ;;  %467 = vmatprep.subr.bf16.mxu0 %v466_v45  ;;  %v494_v45 = vpack.c.bf16 %v322_v44, %v321_v43  ;;  %v261_v44 = vld [vmem:[#allocation3 + $0x1] ss:$4 sm:$0x3] }
  0x28   :  { %485 = vmatpush3.bf16.msra.mxu1 %v484_v30 }
  0x29   :  { %487 = vmatprep.subr.bf16.mxu1 %v486_v33 }
  0x2a   :  { %469 = vmatpush1.bf16.msra.mxu0 %v468_v51 }
  0x2b   :  { %471 = vmatprep.subr.bf16.mxu0 %v470_v55  ;;  %v325_v55 = vld [vmem:[%s840_s3 + $0xe0] sm:$0xff] }
  0x2c   :  { %489 = vmatpush3.bf16.msra.mxu1 %v488_v36  ;;  %v502_v57 = vpack.c.bf16 %v326_v56, %v325_v55 }
  0x2e   :  { %473 = vmatpush1.bf16.msra.mxu0 %v472_v58  ;;  %v309_v58 = vld [vmem:[%s840_s3 + $0x60] sm:$0xff] }
  0x2f   :  { %475 = vmatprep.subr.bf16.mxu0 %v474_v1  ;;  %v504_v60 = vpack.c.bf16 %v310_v59, %v309_v58  ;;  %v312_v1 = vld [vmem:[%s840_s3 + $0x78] sm:$0xff] }
  0x32   :  { %477 = vmatpush1.bf16.msra.mxu0 %v476_v5 }
  0x92   :  { %v58_v37 = vpop.permute.xlu1 %57  ;;  %v36_v38 = vpop.permute.xlu0 %35 }
  0x93   :  { %v38_v41 = vmul.f32 %v36_v38, %v623_v2  ;;  %v60_v48 = vmul.f32 %v58_v37, %v623_v2  ;;  %v319_v37 = vld [vmem:[%s840_s3 + $0xb0] sm:$0xff]  ;;  %v320_v38 = vld [vmem:[%s840_s3 + $0xb8] sm:$0xff] }
  0x94   :  { %v490_v39 = vpack.c.bf16 %v320_v38, %v319_v37  ;;  %v269_v37 = vlaneseq }
  0x95   :  { %40 = vrot.lane.b32.xlu0 %v38_v41, %s575_s13  ;;  %s579_s13 = smov 40   ;;  %v304_v41 = vld [vmem:[%s840_s3 + $0x38] sm:$0xff] }
  0x96   :  { %v492_v42 = vpack.c.bf16 %v304_v41, %v303_v40  ;;  %491 = vmatprep.subr.bf16.mxu1 %v490_v39  ;;  %v270_v40 = vshrl.u32 %v269_v37, 7 }
  0x97   :  { %v69_v49 = vpop.permute.xlu1 %68  ;;  %v47_v50 = vpop.permute.xlu0 %46 }
  0x98   :  { %v49_v52 = vmul.f32 %v47_v50, %v623_v2  ;;  %v71_v62 = vmul.f32 %v69_v49, %v623_v2  ;;  %493 = vmatpush3.bf16.msra.mxu1 %v492_v42  ;;  %v323_v49 = vld [vmem:[%s840_s3 + $0xd0] sm:$0xff]  ;;  %v324_v50 = vld [vmem:[%s840_s3 + $0xd8] sm:$0xff]  ;;  %v271_v41 = vsub.s32 0, %v270_v40  ;;  %v259_v42 = vld [vmem:[#allocation3] ss:$4 sm:$0x3] }
  0x99   :  { %62 = vrot.lane.b32.xlu0 %v60_v48, %s576_s22  ;;  %v496_v48 = vpack.c.bf16 %v306_v47, %v305_v46  ;;  %495 = vmatprep.subr.bf16.mxu1 %v494_v45  ;;  %v498_v51 = vpack.c.bf16 %v324_v50, %v323_v49  ;;  %v275_v43 = vsub.s32 1, %v270_v40 }
  0x9a   :  { %51 = vrot.lane.b32.xlu1 %v49_v52, %s577_s27  ;;  %v307_v52 = vld [vmem:[%s840_s3 + $0x50] sm:$0xff]  ;;  %v272_v45 = vrot.slane %v259_v42, %v271_v41  ;;  %v285_v50 = vrot.slane %v261_v44, %v271_v41 }
  0x9b   :  { %v500_v54 = vpack.c.bf16 %v308_v53, %v307_v52  ;;  %v276_v47 = vrot.slane %v259_v42, %v275_v43  ;;  %v289_v52 = vrot.slane %v261_v44, %v275_v43 }
  0x9c   :  { %v80_v63 = vpop.permute.xlu1 %79  ;;  %v91_v0 = vpop.permute.xlu0 %90  ;;  %497 = vmatpush3.bf16.msra.mxu1 %v496_v48 }
  0x9d   :  { %v82_v4 = vmul.f32 %v80_v63, %v623_v2  ;;  %v93_v6 = vmul.f32 %v91_v0, %v623_v2  ;;  %499 = vmatprep.subr.bf16.mxu1 %v498_v51  ;;  %v311_v63 = vld [vmem:[%s840_s3 + $0x70] sm:$0xff] }
  0x9e   :  { %73 = vrot.lane.b32.xlu1 %v71_v62, %s578_s12  ;;  %v328_v62 = vld [vmem:[%s840_s3 + $0xf8] sm:$0xff]  ;;  %v508_v3 = vpack.c.bf16 %v312_v1, %v311_v63 }
  0x9f   :  { %84 = vrot.lane.b32.xlu0 %v82_v4, %s579_s13  ;;  %v506_v0 = vpack.c.bf16 %v328_v62, %v327_v61 }
  0xa0   :  { %501 = vmatpush3.bf16.msra.mxu1 %v500_v54 }
  0xa1   :  { %v102_v7 = vpop.permute.xlu1 %101  ;;  %503 = vmatprep.subr.bf16.mxu1 %v502_v57 }
  0xa2   :  { %v104_v8 = vmul.f32 %v102_v7, %v623_v2  ;;  %95 = vrot.lane.b32.xlu1 %v93_v6, %s580_s14 }
  0xa4   :  { %106 = vrot.lane.b32.xlu0 %v104_v8, %s581_s15  ;;  %505 = vmatpush3.bf16.msra.mxu1 %v504_v60  ;;  %v410_v60 = vld [vmem:[#allocation3 + $0x2] ss:$0 sm:$0xff] }
  0xa5   :  { %507 = vmatprep.subr.bf16.mxu1 %v506_v0 }
  0xa6   :  { %v113_v9 = vpop.permute.xlu1 %112 }
  0xa7   :  { %v115_v10 = vmul.f32 %v113_v9, %v623_v2 }
  0xa8   :  { %509 = vmatpush3.bf16.msra.mxu1 %v508_v3 }
  0xa9   :  { %117 = vrot.lane.b32.xlu1 %v115_v10, %s582_s1 }
 0x107   :  { %v41_v11 = vpop.permute.xlu0 %40 }
 0x108   :  { %44 = vst.msk [vmem:[#allocation2] sm:$0xff] %vm43_vm1, %v41_v11 }
 0x10b   :  { %v63_v13 = vpop.permute.xlu0 %62 }
 0x10c   :  { %v52_v12 = vpop.permute.xlu1 %51 }
 0x10d   :  { %55 = vst.msk [vmem:[#allocation2] sm:$0xff] %vm54_vm2, %v52_v12 }
 0x10e   :  { %66 = vst.msk [vmem:[#allocation2] sm:$0xff] %vm65_vm3, %v63_v13 }
 0x110   :  { %v74_v14 = vpop.permute.xlu1 %73 }
 0x111   :  { %v85_v15 = vpop.permute.xlu0 %84  ;;  %77 = vst.msk [vmem:[#allocation2] sm:$0xff] %vm76_vm4, %v74_v14 }
 0x112   :  { %88 = vst.msk [vmem:[#allocation2] sm:$0xff] %vm87_vm5, %v85_v15 }
 0x114   :  { %v96_v16 = vpop.permute.xlu1 %95 }
 0x115   :  { %99 = vst.msk [vmem:[#allocation2] sm:$0xff] %vm98_vm6, %v96_v16 }
 0x116   :  { %v107_v2 = vpop.permute.xlu0 %106 }
 0x117   :  { %110 = vst.msk [vmem:[#allocation2] sm:$0xff] %vm109_vm7, %v107_v2 }
 0x11b   :  { %v118_v17 = vpop.permute.xlu1 %117 }
 0x11c   :  { %121 = vst.msk [vmem:[#allocation2] sm:$0xff] %vm120_vm8, %v118_v17 }
 0x123   :  { %v122_v18 = vld [vmem:[#allocation2] sm:$0xff] }
 0x124   :  { %220 = vmatmul.mubr.f32.vlgmr.msra.gmra.mrb[0].mxu0 %v122_v18 }
 0x1f7   :  { %v221_v4 = vpop.f32.mrb[0].mxu0 }
 0x1f8   :  { %v226_v5 = vrot.slane %v221_v4, 4  ;;  %v223_v6 = vpop.f32.mrb[1].mxu0 }
 0x1f9   :  { %v232_v7 = vrot.slane %v223_v6, 4 }
 0x1fa   :  { %v227_v8 = vadd.f32 %v226_v5, %v221_v4 }
 0x1fb   :  { %v233_v9 = vadd.f32 %v232_v7, %v223_v6 }
 0x1fc   :  { %v228_v10 = vrot.slane %v227_v8, 2 }
 0x1fd   :  { %v234_v11 = vrot.slane %v233_v9, 2 }
 0x1fe   :  { %v229_v12 = vadd.f32 %v228_v10, %v227_v8 }
 0x1ff   :  { %v235_v13 = vadd.f32 %v234_v11, %v233_v9 }
 0x200   :  { %v230_v14 = vrot.slane %v229_v12, 1 }
 0x201   :  { %v236_v15 = vrot.slane %v235_v13, 1 }
 0x202   :  { %v231_v16 = vadd.f32 %v230_v14, %v229_v12 }
 0x203   :  { %v237_v2 = vadd.f32 %v236_v15, %v235_v13 }
 0x204   :  { %v239_v17 = vmul.f32 0.125, %v231_v16 }
 0x205   :  { %v240_v18 = vmul.f32 0.125, %v237_v2 }
 0x206   :  { %v241_v19 = vsub.f32 %v221_v4, %v239_v17 }
 0x207   :  { %v242_v20 = vsub.f32 %v223_v6, %v240_v18 }
 0x208   :  { %v243_v21 = vmul.f32 %v241_v19, %v241_v19 }
 0x209   :  { %v244_v22 = vmul.f32 %v242_v20, %v242_v20 }
 0x20a   :  { %v245_v23 = vrot.slane %v243_v21, 4 }
 0x20b   :  { %v251_v24 = vrot.slane %v244_v22, 4 }
 0x20c   :  { %v246_v25 = vadd.f32 %v245_v23, %v243_v21 }
 0x20d   :  { %v252_v26 = vadd.f32 %v251_v24, %v244_v22 }
 0x20e   :  { %v247_v27 = vrot.slane %v246_v25, 2 }
 0x20f   :  { %v253_v28 = vrot.slane %v252_v26, 2 }
 0x210   :  { %v248_v29 = vadd.f32 %v247_v27, %v246_v25 }
 0x211   :  { %v254_v30 = vadd.f32 %v253_v28, %v252_v26 }
 0x212   :  { %v249_v31 = vrot.slane %v248_v29, 1 }
 0x213   :  { %v255_v32 = vrot.slane %v254_v30, 1 }
 0x214   :  { %v250_v33 = vadd.f32 %v249_v31, %v248_v29 }
 0x215   :  { %v256_v34 = vadd.f32 %v255_v32, %v254_v30 }
 0x216   :  { %v257_v35 = vmul.f32 0.125, %v250_v33 }
 0x217   :  { %v258_v36 = vmul.f32 0.125, %v256_v34 }
 0x218   :  { %v262_v38 = vadd.f32 1e-05, %v257_v35 }
 0x219   :  { %v263_v39 = vadd.f32 1e-05, %v258_v36 }
 0x21a   :  { %537 = vrsqrt.f32 %v262_v38 }
 0x21b   :  { %539 = vrsqrt.f32 %v263_v39 }
 0x224   :  { %v538_v46 = vpop.eup %537 }
 0x225   :  { %v540_v48 = vpop.eup %539  ;;  %v266_v49 = vmul.f32 %v538_v46, %v241_v19 }
 0x226   :  { %v267_v51 = vmul.f32 %v540_v48, %v242_v20 }
 0x227   :  { %v279_v53 = vmul.f32 %v272_v45, %v266_v49 }
 0x228   :  { %v280_v54 = vmul.f32 %v276_v47, %v267_v51 }
 0x229   :  { %v292_v55 = vadd.f32 %v285_v50, %v279_v53 }
 0x22a   :  { %v293_v56 = vadd.f32 %v289_v52, %v280_v54 }
 0x22b   :  { %v294_v58 = vmax.f32 %v292_v55, 0.0 }
 0x22c   :  { %v295_v57 = vmax.f32 %v293_v56, 0.0 }
 0x22e   :  { %397 = vmatprep.mubr.f32.mxu1 %v295_v57 }
 0x22f   :  { %398 = vmatmul.mubr.f32.vlgmr.msra.gmra.mrb[0].mxu1 %v294_v58 }
 0x302   :  { %v443_v59 = vpop.f32.mrb[0].mxu1 }
 0x303   :  { %v444_v61 = vpop.f32.mrb[1].mxu1 }
 0x304   :  { %v445_v62 = vadd.f32 %v444_v61, %v443_v59 }
 0x306   :  { %v400_v63 = vadd.f32 %v445_v62, %v410_v60 }
 0x308   :  { %404 = vst.msk [vmem:[%s841_s4] sm:$0xff] %vm403_vm9, %v400_v63 }
 0x309   :  { %409 = vsyncpa [#allocation4], 1 }

</bundles_post_ra>
